<compile_context>
chip_gen: v7x
topology: tpu7x:2x2x1
jax: 0.10.0
libtpu: 0.0.40
codegen_flags: <defaults>
</compile_context>

<pallas_src>
import functools

import jax
import jax.numpy as jnp
from jax.experimental import pallas as pl
from jax.experimental.pallas import tpu as pltpu


def _round_up(a: int, b: int) -> int:
    return ((a + b - 1) // b) * b


def _cdiv(a: int, b: int) -> int:
    return (a + b - 1) // b


def _gaussian_kernel(x_ref, mu_s_ref, c_ref, inv_std_ref, out_ref, *, no_exp: bool):
    # x_ref:       (TN, D)   row tile of samples (input dtype: f32 or bf16)
    # mu_s_ref:    (D, TK)   (mu * inv_std)^T tile (same dtype as x for bf16 MXU)
    # c_ref:       (1, TK)   -0.5 * sum_d mu^2 * inv_std (f32)
    # inv_std_ref: (1, D)    1 / std (f32)
    # out_ref:     (TN, TK)  lane-dense output tile
    xb = x_ref[...]                                                        # (TN, D)
    x32 = xb.astype(jnp.float32)
    # -0.5 * sum_d x^2 / std : only cross-lane reduction (XLU), f32.
    xsq = -0.5 * jnp.sum(x32 * x32 * inv_std_ref[...], axis=-1, keepdims=True)  # (TN, 1)
    # x @ (mu/std)^T on the MXU; bf16 operands when inputs are bf16, f32 accumulate.
    q = jnp.dot(xb, mu_s_ref[...], preferred_element_type=jnp.float32)     # (TN, TK)
    q = q + xsq + c_ref[...]
    if not no_exp:
        q = jnp.exp(q)
    out_ref[...] = q.astype(out_ref.dtype)


def _spec(block_shape, index_map, *, single_buffer=False):
    """BlockSpec helper: single-buffer truly constant inputs when supported."""
    if single_buffer:
        try:
            return pl.BlockSpec(block_shape, index_map, pipeline_mode=pl.Buffered(1))
        except Exception:  # pragma: no cover - older JAX without pipeline_mode
            pass
    return pl.BlockSpec(block_shape, index_map)


def gaussian_forward(x, mu, std, *, no_exp=False, get_components=False, tn=1024):
    """Pallas equivalent of Gaussian.forward.

    x:   (N, D)
    mu:  (K, num_components, D)   (only component 0 is used, as in PyTorch)
    std: (D,)
    returns (N, K), or (N, 1, K) ones if get_components=True.
    """
    N, D = x.shape
    K = mu.shape[0]

    if get_components:
        # torch.ones_like(intermediate.unsqueeze(1)): trivial — skip the kernel
        # (and the whole HBM pass over x) entirely.
        return jnp.ones((N, 1, K), dtype=x.dtype)

    # ---- constants hoisted to the wrapper (f32 math) -----------------------
    inv_std = (1.0 / std.astype(jnp.float32)).reshape(1, D)                 # (1, D)
    mu0 = mu[:, 0, :].astype(jnp.float32)                                   # (K, D)
    mu_s = jnp.transpose(mu0 * inv_std)                                     # (D, K)
    c = (-0.5 * jnp.sum(mu0 * mu0 * inv_std, axis=-1)).reshape(1, K)        # (1, K)

    # Lane-dense output: pad the class axis up to a multiple of 128.
    Kp = _round_up(max(K, 1), 128)
    if Kp != K:
        mu_s = jnp.pad(mu_s, ((0, 0), (0, Kp - K)))
        c = jnp.pad(c, ((0, 0), (0, Kp - K)))

    # bf16 inputs -> bf16 MXU operands (f32 accumulation); otherwise f32.
    mxu_dtype = jnp.bfloat16 if x.dtype == jnp.bfloat16 else jnp.float32
    mu_s = mu_s.astype(mxu_dtype)

    # ---- VMEM-aware tiling --------------------------------------------------
    try:
        vmem_cap = int(pltpu.get_tpu_info().vmem_capacity_bytes)
    except Exception:
        vmem_cap = 64 * 1024 * 1024                       # v7x-safe fallback
    budget = int(vmem_cap * 0.60)                         # tile-sizing budget
    vmem_limit = int(vmem_cap * 0.85)                     # compiler scoped limit

    x_item = jnp.dtype(x.dtype).itemsize
    mu_item = jnp.dtype(mxu_dtype).itemsize

    # Class tile: bound the resident (D, TK) mu buffer to ~1/3 of the budget.
    tk = Kp
    while tk > 128 and D * tk * mu_item > budget // 3:
        tk //= 2
    tk = max(128, _round_up(tk, 128))
    nk = _cdiv(Kp, tk)
    mu_bufs = 1 if nk == 1 else 2                         # single-buffer when constant

    # Row tile: large for bandwidth, but keep >=2 grid steps when nk == 1 so a
    # v7x chip can split the parallel axis across its two TensorCores.
    tn_eff = max(8, _round_up(min(tn, _round_up(N, 8)), 8))
    if nk == 1 and N > 8:
        tn_eff = min(tn_eff, max(8, _round_up(_cdiv(N, 2), 8)))

    def step_bytes(t):
        return (2 * t * D * x_item                        # x tile, double-buffered
                + 2 * t * tk * x_item                     # out tile, double-buffered
                + mu_bufs * D * tk * mu_item              # resident / streamed mu_s
                + 2 * tk * 4 + D * 4                      # c, inv_std
                + t * tk * 4 + t * (D + 1) * 4)           # f32 temporaries headroom

    while tn_eff > 8 and step_bytes(tn_eff) > budget:
        tn_eff = max(8, _round_up(tn_eff // 2, 8))
    nrows = _cdiv(N, tn_eff)

    kernel = functools.partial(_gaussian_kernel, no_exp=no_exp)
    out = pl.pallas_call(
        kernel,
        out_shape=jax.ShapeDtypeStruct((N, Kp), x.dtype),
        grid=(nrows, nk),
        in_specs=[
            _spec((tn_eff, D), lambda i, j: (i, 0)),                         # x rows
            _spec((D, tk), lambda i, j: (0, j), single_buffer=(nk == 1)),    # (mu/std)^T
            _spec((1, tk), lambda i, j: (0, j), single_buffer=(nk == 1)),    # class bias
            _spec((1, D), lambda i, j: (0, 0), single_buffer=True),          # 1/std
        ],
        out_specs=pl.BlockSpec((tn_eff, tk), lambda i, j: (i, j)),
        compiler_params=pltpu.CompilerParams(
            dimension_semantics=("parallel", "parallel"),
            vmem_limit_bytes=vmem_limit),
    )(x, mu_s, c, inv_std)

    # No row slice needed (no row padding). Slice classes only if padded.
    return out if Kp == K else out[:, :K]


def _reference_forward(x, mu, std, no_exp=False):
    # pure-JAX reference matching the PyTorch einsum exactly
    diff = x[:, None, :] - mu[None, :, 0, :]                                 # (N, K, D)
    q = -0.5 * jnp.sum(diff * diff * (1.0 / std)[None, None, :], axis=-1)
    return q if no_exp else jnp.exp(q)


if __name__ == "__main__":
    # Small shapes consistent with the module:
    #   N samples, K classes, num_components mixture components, D feature dim
    N, K, num_components, D = 16, 4, 3, 32

    key = jax.random.PRNGKey(0)
    kx, kmu, kstd = jax.random.split(key, 3)

    x = jax.random.normal(kx, (N, D), dtype=jnp.float32)
    mu = jax.random.normal(kmu, (K, num_components, D), dtype=jnp.float32)
    # std must be positive (per-dimension variance-like scale)
    std = jax.random.uniform(kstd, (D,), dtype=jnp.float32, minval=0.5, maxval=1.5)

    # exp path (f32)
    out = jax.block_until_ready(gaussian_forward(x, mu, std))
    ref = _reference_forward(x, mu, std)
    assert out.shape == (N, K)
    assert out.dtype == x.dtype
    assert jnp.allclose(out, ref, rtol=1e-3, atol=1e-5)

    # no_exp path (f32)
    out_ne = jax.block_until_ready(gaussian_forward(x, mu, std, no_exp=True))
    ref_ne = _reference_forward(x, mu, std, no_exp=True)
    assert jnp.allclose(out_ne, ref_ne, rtol=1e-3, atol=1e-3)

    # non-divisible N exercises the ragged last-block path (no host-side padding)
    N2 = 50
    x2 = jax.random.normal(jax.random.PRNGKey(1), (N2, D), dtype=jnp.float32)
    out2 = jax.block_until_ready(gaussian_forward(x2, mu, std))
    assert out2.shape == (N2, K)
    assert jnp.allclose(out2, _reference_forward(x2, mu, std), rtol=1e-3, atol=1e-5)

    # bf16 path: bf16 MXU operands, f32 accumulation, bf16 output
    xb = x.astype(jnp.bfloat16)
    out_bf = jax.block_until_ready(gaussian_forward(xb, mu, std, no_exp=True))
    ref_bf = _reference_forward(xb.astype(jnp.float32), mu, std, no_exp=True)
    assert out_bf.shape == (N, K) and out_bf.dtype == jnp.bfloat16
    assert jnp.allclose(out_bf.astype(jnp.float32), ref_bf, rtol=5e-2, atol=1.0)

    # get_components path (trivial ones tensor, no kernel launch)
    comps = gaussian_forward(x, mu, std, get_components=True)
    assert comps.shape == (N, 1, K) and bool(jnp.all(comps == 1.0))

    print("KERNEL_OK")
</pallas_src>

<mosaic_0001>
module attributes {stable_mosaic.version = 11 : i64} {
  func.func @_gaussian_kernel(%arg0: i32, %arg1: i32, %arg2: memref<8x32xf32, #tpu.memory_space<vmem>>, %arg3: memref<32x128xf32, #tpu.memory_space<vmem>>, %arg4: memref<1x128xf32, #tpu.memory_space<vmem>>, %arg5: memref<1x32xf32, #tpu.memory_space<vmem>>, %arg6: memref<8x128xf32, #tpu.memory_space<vmem>>) attributes {dimension_semantics = [#tpu.dimension_semantics<parallel>, #tpu.dimension_semantics<parallel>], iteration_bounds = array<i64: 2, 1>, scalar_prefetch = 0 : i64, scratch_operands = 0 : i64, tpu.core_type = #tpu.core_type<tc>, window_params = [{transform_indices = @transform_0, window_bounds = array<i64: 8, 32>}, {pipeline_mode = #tpu.pipeline_mode<synchronous>, transform_indices = @transform_1, window_bounds = array<i64: 32, 128>}, {pipeline_mode = #tpu.pipeline_mode<synchronous>, transform_indices = @transform_2, window_bounds = array<i64: 1, 128>}, {pipeline_mode = #tpu.pipeline_mode<synchronous>, transform_indices = @transform_3, window_bounds = array<i64: 1, 32>}, {transform_indices = @transform_4, window_bounds = array<i64: 8, 128>}]} {
    %c0 = arith.constant 0 : index
    %c0_0 = arith.constant 0 : index
    %0 = vector.load %arg2[%c0, %c0_0] : memref<8x32xf32, #tpu.memory_space<vmem>>, vector<8x32xf32>
    %1 = arith.mulf %0, %0 : vector<8x32xf32>
    %c0_1 = arith.constant 0 : index
    %c0_2 = arith.constant 0 : index
    %2 = vector.load %arg5[%c0_1, %c0_2] : memref<1x32xf32, #tpu.memory_space<vmem>>, vector<1x32xf32>
    %3 = vector.broadcast %2 : vector<1x32xf32> to vector<8x32xf32>
    %4 = arith.mulf %1, %3 : vector<8x32xf32>
    %cst = arith.constant dense<0.000000e+00> : vector<8xf32>
    %5 = vector.multi_reduction <add>, %4, %cst [1] : vector<8x32xf32> to vector<8xf32>
    %6 = vector.shape_cast %5 : vector<8xf32> to vector<8x1xf32>
    %cst_3 = arith.constant -5.000000e-01 : f32
    %7 = vector.broadcast %cst_3 : f32 to vector<8x1xf32>
    %8 = arith.mulf %7, %6 : vector<8x1xf32>
    %c0_4 = arith.constant 0 : index
    %c0_5 = arith.constant 0 : index
    %9 = vector.load %arg3[%c0_4, %c0_5] : memref<32x128xf32, #tpu.memory_space<vmem>>, vector<32x128xf32>
    %cst_6 = arith.constant dense<0.000000e+00> : vector<8x128xf32>
    %10 = tpu.matmul %0, %9, %cst_6 {dimension_numbers = #tpu.dot_dimension_numbers<[1], [0], [0], [1], [0, 0, 1, 1], [], []>} : vector<8x32xf32>, vector<32x128xf32>, vector<8x128xf32> -> vector<8x128xf32>
    %11 = vector.broadcast %8 : vector<8x1xf32> to vector<8x128xf32>
    %12 = arith.addf %10, %11 : vector<8x128xf32>
    %c0_7 = arith.constant 0 : index
    %c0_8 = arith.constant 0 : index
    %13 = vector.load %arg4[%c0_7, %c0_8] : memref<1x128xf32, #tpu.memory_space<vmem>>, vector<1x128xf32>
    %14 = vector.broadcast %13 : vector<1x128xf32> to vector<8x128xf32>
    %15 = arith.addf %12, %14 : vector<8x128xf32>
    %16 = math.exp %15 : vector<8x128xf32>
    %c0_9 = arith.constant 0 : index
    %c0_10 = arith.constant 0 : index
    %17 = vector.load %arg6[%c0_9, %c0_10] : memref<8x128xf32, #tpu.memory_space<vmem>>, vector<8x128xf32>
    tpu.vector_store %arg6[%c0_9, %c0_10], %16 {strides = array<i32>} : memref<8x128xf32, #tpu.memory_space<vmem>>, vector<8x128xf32>,
    return
  }
  func.func @transform_0(%arg0: i32, %arg1: i32) -> (i32, i32) {
    %c0_i32 = arith.constant 0 : i32
    %c0_i32_0 = arith.constant 0 : i32
    return %arg0, %c0_i32 : i32, i32
  }
  func.func @transform_1(%arg0: i32, %arg1: i32) -> (i32, i32) {
    %c0_i32 = arith.constant 0 : i32
    %c0_i32_0 = arith.constant 0 : i32
    return %c0_i32, %arg1 : i32, i32
  }
  func.func @transform_2(%arg0: i32, %arg1: i32) -> (i32, i32) {
    %c0_i32 = arith.constant 0 : i32
    %c0_i32_0 = arith.constant 0 : i32
    return %c0_i32, %arg1 : i32, i32
  }
  func.func @transform_3(%arg0: i32, %arg1: i32) -> (i32, i32) {
    %c0_i32 = arith.constant 0 : i32
    %c0_i32_0 = arith.constant 0 : i32
    %c0_i32_1 = arith.constant 0 : i32
    return %c0_i32, %c0_i32_0 : i32, i32
  }
  func.func @transform_4(%arg0: i32, %arg1: i32) -> (i32, i32) {
    %c0_i32 = arith.constant 0 : i32
    return %arg0, %arg1 : i32, i32
  }
}

</mosaic_0001>

<bundles_post_ra>
// kernel: tpu_custom_call.1
= control target key start
LH: loop header
LB: loop body
LE: loop exit
PB: predicated region body
PF: predicated region fallthrough
CT: control target
= control target key end

     0   :  { %9 = vsyncpa [#allocation3], 0  ;;  %s1008_s0 = inlined_call_operand.hbm [shape: f32[16,32], index: 0, kind: input, shape index: {}]   ;;  %s1009_s1 = inlined_call_operand.hbm [shape: f32[32,128], index: 1, kind: input, shape index: {}]   ;;  %s1010_s2 = inlined_call_operand.vmem [shape: f32[1,128], index: 2, kind: input, shape index: {}]   ;;  %s1011_s3 = inlined_call_operand.vmem [shape: f32[1,32], index: 3, kind: input, shape index: {}]   ;;  %s1012_s4 = inlined_call_operand.hbm [shape: f32[16,128], index: 4, kind: output, shape index: {}]  }
   0x1   :  { %11 = vsyncpa [#allocation3 + $0x1], 0 }
   0x2   :  { %12 = vsyncpa [#allocation6], 0 }
   0x3   :  { %13 = vsyncpa [#allocation4], 0 }
   0x4   :  { %15 = vsyncpa [#allocation4 + $0x1], 0  ;;  %s784_s15 = smov 0   ;;  %s786_s16 = smov 0  }
   0x5   :  { %s788_s17 = smov 0   ;;  %s790_s18 = smov 0  }
   0x6   :  { %s792_s19 = smov 0   ;;  %s794_s20 = smov 0  }
   0x7 LB: > { %s484_s21 = sadd.s32 4294967295, %s749_s20   ;;  %s485_s22 = sadd.s32 4294967294, %s749_s20   ;;  %s749_s20 = sphi %s794_s20, %s21_s20   ;;  %s745_s19 = sphi %s792_s19, %s1036_s19   ;;  %s741_s18 = sphi %s790_s18, %s1035_s18   ;;  %s737_s17 = sphi %s788_s17, %s1034_s17   ;;  %s733_s16 = sphi %s786_s16, %s1033_s16   ;;  %s729_s15 = sphi %s784_s15, %s1032_s15  }
   0x8   : > { %p53_p0 = scmp.ne.s32.totalorder %s733_s16, %s729_s15  ;;  %p818_p1 = scmp.eq.s32.totalorder %s484_s21, 0 }
   0x9   : > { %p822_p2 = scmp.eq.s32.totalorder %s484_s21, 1  ;;  %p158_p3 = scmp.eq.s32.totalorder %s485_s22, 1 }
   0xa   : > { %s1017_s23 = scalar_select %p818_p1, 1, 0 }
   0xb   : > { %s1018_s24 = scalar_select %p822_p2, 1, 0 }
   0xc   : > { %p828_p4 = por %p818_p1, %p53_p0  ;;  %p486_p5 = scmp.ge.s32.totalorder %s749_s20, 1 }
   0xd   : > { %p833_p6 = por %p158_p3, %p53_p0  ;;  %p165_p7 = scmp.lt.s32.totalorder %s749_s20, 3 }
   0xe   : > { %s1019_s25 = scalar_select %p828_p4, 1, 0 }
   0xf   : > { %s1020_s26 = scalar_select %p833_p6, 1, 0 }
  0x10   : > { %p838_p8 = pnand %p486_p5, %p165_p7  ;;  %s751_s28 = smov [#allocation5]  }
  0x11   : > { %s179_s29 = sshll.u32 %s751_s28, 4  ;;  %s33_s5 = sadd.s32 1, %s745_s19  ;;  %s180_s29 = int_to_ptr.vmem [resolvable:$true] %s179_s29 }
  0x12   : > { %s1021_s27 = scalar_select %p838_p8, 1, 0 }
  0x13   : > { %p533_p9 = pneg %p838_p8  ;;  %s605_s8 = scalar_lea.hbm %s1009_s1, 512 }
  0x14   : > { %p606_p12 = scmp.ne.s32.totalorder %s1009_s1, %s605_s8  ;;  %p612_p5 = scmp.lt.u32.totalorder %s605_s8, %s1009_s1 }
  0x15   : > { %p847_p11 = pnand %p533_p9, %p818_p1 }
  0x17   : > { %p607_p13 = pneg %p847_p11 }
  0x19   : > { %p608_p0 = pnand %p607_p13, %p606_p12 }
  0x1b   : > { %p609_p3 = pneg %p608_p0 }
  0x1d   : > { %p614_p7 = pnand %p612_p5, %p609_p3 }
  0x1f   : > { %617 = shalt.err (!%p614_p7)
}
  0x20   : > { %s618_s13 = scalar_lea.vmem %s180_s29, 512  ;;  %p626_p1 = scmp.lt.s32.totalorder %s180_s29, %s180_s29 }
  0x21   : > { %p619_p9 = scmp.ne.s32.totalorder %s180_s29, %s618_s13  ;;  %p627_p4 = scmp.lt.s32.totalorder %s618_s13, %s618_s13 }
  0x23   : > { %p621_p10 = pnand %p619_p9, %p607_p13  ;;  %p628_p8 = por %p627_p4, %p626_p1 }
  0x25   : > { %p622_p6 = pneg %p621_p10 }
  0x27   : > { %p629_p2 = pnand %p628_p8, %p622_p6 }
  0x29   : > { %632 = shalt.err (!%p629_p2)
}
  0x2a   : > { %s752_s14 = smov 128   ;;  %s753_s21 = smov 8  }
  0x2b   : > { %536 = dma.hbm_to_vmem [thread:$0]  (!%p847_p11), %s1009_s1, 512, %s180_s29, [#allocation6], %s752_s14, %s752_s14, %s753_s21  }
  0x2c   : > { %p35_p1 = scmp.ge.s32.totalorder %s33_s5, 2  ;;  %s40_s6 = sadd.s32 1, %s737_s17 }
  0x2d   : > { %p47_p2 = scmp.ne.s32.totalorder %s737_s17, %s733_s16  ;;  %p48_p4 = scmp.eq.s32.totalorder %s749_s20, 0 }
  0x2e   : > { %s1038_s5 = smov (%p35_p1, %s33_s5), 0  ;;  %p1024_p8 = scmp.ne.s32.totalorder %s1018_s24, 0 }
  0x2f   : > { %p874_p6 = por %p48_p4, %p47_p2  ;;  %s37_s30 = ssub.s32 %s745_s19, %s1038_s5 }
  0x30   : > { %p880_p10 = por %p1024_p8, %p47_p2  ;;  %p546_p12 = scmp.lt.s32.totalorder %s749_s20, 2 }
  0x31   : > { %p38_p11 = scmp.eq.s32.totalorder %s37_s30, 0  ;;  %s202_s29 = sand.u32 1, %s737_s17  }
  0x32   : > { %s490_s9 = sshll.u32 %s202_s29, 3  ;;  %s491_s11 = sshll.u32 %s745_s19, 7 }
  0x33   : > { %s889_s10 = scalar_select %p38_p11, %s737_s17, %s40_s6  }
  0x34   : > { %s895_s14 = scalar_lea.hbm %s1008_s0, %s491_s11  ;;  %s206_s24 = scalar_lea.vmem [#allocation2], %s490_s9 }
  0x35   : > { %s213_s21 = sshll.u32 %s206_s24, 4  ;;  %p901_p13 = pnand %p546_p12, %p874_p6  ;;  %s897_s21 = int_to_ptr.vmem [resolvable:$true] %s213_s21 }
  0x36   : > { %s203_s28 = scalar_lea.sflag [#allocation3], %s202_s29  ;;  %s633_s6 = scalar_lea.hbm %s895_s14, 128 }
  0x37   : > { %p634_p0 = scmp.ne.s32.totalorder %s895_s14, %s633_s6  ;;  %p635_p3 = pneg %p901_p13 }
  0x38   : > { %s638_s11 = scalar_lea.hbm %s1008_s0, 256  ;;  %p639_p9 = scmp.lt.u32.totalorder %s895_s14, %s1008_s0 }
  0x39   : > { %p636_p5 = pnand %p635_p3, %p634_p0  ;;  %p640_p1 = scmp.lt.u32.totalorder %s638_s11, %s633_s6 }
  0x3a   : > { %p642_p4 = scmp.lt.u32.totalorder %s633_s6, %s895_s14 }
  0x3b   : > { %p637_p7 = pneg %p636_p5  ;;  %p641_p2 = por %p640_p1, %p639_p9 }
  0x3d   : > { %p643_p6 = por %p642_p4, %p641_p2 }
  0x3f   : > { %p644_p8 = pnand %p643_p6, %p637_p7 }
  0x41   : > { %647 = shalt.err (!%p644_p8)
}
  0x42   : > { %s648_s29 = scalar_lea.vmem %s897_s21, 128  ;;  %s754_s13 = smov [#allocation2]  }
  0x43   : > { %p649_p12 = scmp.ne.s32.totalorder %s897_s21, %s648_s29  ;;  %s653_s24 = sshll.u32 %s754_s13, 4  ;;  %s654_s24 = int_to_ptr.vmem [resolvable:$false] %s653_s24 }
  0x44   : > { %s655_s30 = scalar_lea.vmem %s654_s24, 256  ;;  %p656_p5 = scmp.lt.s32.totalorder %s897_s21, %s654_s24 }
  0x45   : > { %p651_p11 = pnand %p649_p12, %p635_p3  ;;  %p657_p9 = scmp.lt.s32.totalorder %s655_s30, %s648_s29 }
  0x47   : > { %p652_p0 = pneg %p651_p11  ;;  %p658_p1 = por %p657_p9, %p656_p5 }
  0x49   : > { %p659_p2 = pnand %p658_p1, %p652_p0 }
  0x4b   : > { %662 = shalt.err (!%p659_p2)
}
  0x4c   : > { %540 = dma.hbm_to_vmem [thread:$0]  (!%p901_p13), %s895_s14, 128, %s897_s21, %s203_s28  }
  0x4d   : > { %p1027_p7 = scmp.ne.s32.totalorder %s1021_s27, 0 }
  0x4e   : > { %s933_s6 = sand.u32 (!%p1027_p7), 1, %s733_s16   ;;  %p1028_p3 = scmp.ne.s32.totalorder (!%p1027_p7), %s1019_s25, 0 }
  0x4f   : > { %222 = sbr.rel (%p1027_p7) target bundleno = 344 (0x158), region = 36  ;;  %s493_s9 = sshll.u32 (!%p1027_p7), %s933_s6, 3 }
  0x50   : > { %s225_s11 = scalar_lea.sflag (!%p1027_p7), [#allocation3], %s933_s6  ;;  %s228_s7 = scalar_lea.vmem (!%p1027_p7), [#allocation2], %s493_s9 }
  0x56   : > { %716 = dma.done.wait (%p1028_p3), %s225_s11, 128  }
  0x57   : > { %718 = vsyncadd (%p1028_p3), %s225_s11, 4294967168  ;;  %p1029_p13 = scmp.ne.s32.totalorder %s1017_s23, 0 }
  0x59   : > { %720 = dma.done.wait (%p1029_p13), [#allocation6], 512  }
  0x5a   : > { %722 = vsyncadd (%p1029_p13), [#allocation6], 4294966784  ;;  %v755_v0 = vmov 0.0|0.0   ;;  %vm756_vm0 = vmmov 0   ;;  %v757_v1 = vmov 0.0   ;;  %v278_v2 = vld [vmem:[#allocation5] sm:$0xff] }
  0x5b   : > { %519 = vmatprep.subr.bf16.mxu0 %v755_v0  ;;  %516 = vmatprep.mubr.msk.f32.mxu0 %vm756_vm0, %v757_v1  ;;  %v279_v3 = vld [vmem:[#allocation5 + $0x8] sm:$0xff]  ;;  %v280_v4 = vld [vmem:[#allocation5 + $0x10] sm:$0xff]  ;;  %v281_v6 = vld [vmem:[#allocation5 + $0x18] sm:$0xff]  ;;  %vm273_vm1 = vcmask 261120   ;;  %s500_s21 = sshll.u32 %s741_s18, 7  ;;  %s259_s22 = scalar_lea.vmem [#allocation7], %s493_s9 }
  0x5c   : > { %v520_v5 = vpack.c.bf16 %v279_v3, %v278_v2  ;;  %v263_v7 = vld [vmem:[%s228_s7] sm:$0xff]  ;;  %v523_v10 = vpack.c.bf16 %v281_v6, %v280_v4  ;;  %s381_s28 = sshll.u32 %s259_s22, 4  ;;  %s959_s13 = scalar_lea.hbm %s1012_s4, %s500_s21  ;;  %s961_s28 = int_to_ptr.vmem [resolvable:$true] %s381_s28 }
  0x5d   : > { %v496_v8 = vld [vmem:[%s1011_s3] ss:$0 sm:$0xff]  ;;  %v264_v9 = vmul.f32 %v263_v7, %v263_v7  ;;  %s367_s24 = scalar_lea.sflag [#allocation4], %s933_s6  ;;  %s663_s30 = scalar_lea.vmem %s961_s28, 128 }
  0x5e   : > { %521 = vmatpush3.bf16.msra.mxu0 %v520_v5  ;;  %v498_v16 = vld [vmem:[%s1010_s2] ss:$0 sm:$0xff]  ;;  %p664_p4 = scmp.ne.s32.totalorder %s961_s28, %s663_s30  ;;  %s758_s18 = smov [#allocation7]  }
  0x5f   : > { %522 = vmatprep.subr.bf16.mxu0 %v755_v0  ;;  %v272_v11 = vmul.f32 %v496_v8, %v264_v9  ;;  %s667_s9 = sshll.u32 %s758_s18, 4  ;;  %s668_s9 = int_to_ptr.vmem [resolvable:$false] %s667_s9 }
  0x60   : > { %p665_p6 = pnand %p664_p4, %p880_p10  ;;  %s669_s11 = scalar_lea.vmem %s668_s9, 256 }
  0x61   : > { %v274_v12 = vsel %vm273_vm1, %v272_v11, 0.0  ;;  %p670_p12 = scmp.lt.s32.totalorder %s961_s28, %s668_s9  ;;  %p671_p11 = scmp.lt.s32.totalorder %s669_s11, %s663_s30 }
  0x62   : > { %524 = vmatpush3.bf16.msra.mxu0 %v523_v10  ;;  %275 = vadd.xlane.f32.xlu0 %v274_v12  ;;  %p666_p8 = pneg %p665_p6 }
  0x63   : > { %p672_p0 = por %p671_p11, %p670_p12 }
  0x65   : > { %517 = vmatmul.mubr.msk.f32.vlgmr.msra.gmra.mrb[0].mxu0 %vm273_vm1, %v263_v7  ;;  %p673_p5 = pnand %p672_p0, %p666_p8 }
  0xef   : > { %v276_v13 = vpop.xlane.xlu0 %275 }
  0xf0   : > { %v277_v14 = vmul.f32 -0.5, %v276_v13 }
 0x138   : > { %v351_v15 = vpop.f32.mrb[0].mxu0 }
 0x139   : > { %v352_v17 = vadd.f32 %v351_v15, %v277_v14  ;;  %v518_v18 = vpop.f32.mrb[1].mxu0 }
 0x13b   : > { %v362_v19 = vadd.f32 %v498_v16, %v352_v17 }
 0x13d   : > { %v363_v20 = vmul.f32 1.442695, %v362_v19 }
 0x13f   : > { %603 = vpow2.f32 %v363_v20 }
 0x149   : > { %v604_v21 = vpop.eup %603 }
 0x14a   : > { %365 = vst [vmem:[%s259_s22] sm:$0xff] %v604_v21 }
 0x14b   : > { %676 = shalt.err (!%p673_p5)
}
 0x14c   : > { %s677_s6 = scalar_lea.hbm %s959_s13, 128  ;;  %s681_s25 = scalar_lea.hbm %s1012_s4, 256 }
 0x14d   : > { %p678_p9 = scmp.ne.s32.totalorder %s959_s13, %s677_s6  ;;  %p682_p7 = scmp.lt.u32.totalorder %s959_s13, %s1012_s4 }
 0x14e   : > { %p683_p3 = scmp.lt.u32.totalorder %s681_s25, %s677_s6  ;;  %p685_p4 = scmp.lt.u32.totalorder %s677_s6, %s959_s13 }
 0x14f   : > { %p679_p1 = pnand %p678_p9, %p880_p10 }
 0x150   : > { %p684_p13 = por %p683_p3, %p682_p7 }
 0x151   : > { %p680_p2 = pneg %p679_p1 }
 0x152   : > { %p686_p6 = por %p685_p4, %p684_p13 }
 0x154   : > { %p687_p8 = pnand %p686_p6, %p680_p2 }
 0x156   : > { %690 = shalt.err (!%p687_p8)
}
 0x157   : > { %531 = dma.vmem_to_hbm [thread:$0]  (%p880_p10), %s961_s28, 128, %s959_s13, %s367_s24  }
 0x158 PF: > { %s393_s21 = sand.u32 1, %s729_s15   ;;  %p1030_p12 = scmp.ne.s32.totalorder %s1020_s26, 0 }
 0x159   : > { %p1031_p11 = scmp.ge.s32.totalorder %s749_s20, 2  ;;  %s394_s22 = scalar_lea.sflag [#allocation4], %s393_s21 }
 0x15b   : > { %p542_p0 = pnand %p1031_p11, %p1030_p12 }
 0x15d   : > { %724 = dma.done.wait (!%p542_p0), %s394_s22, 128  }
 0x15e   : > { %726 = vsyncadd (!%p542_p0), %s394_s22, 4294967168  ;;  %s21_s20 = sadd.s32 1, %s749_s20   ;;  %s1032_s15 = smov %s733_s16 }
 0x15f   : > { %p18_p5 = scmp.ge.s32.totalorder %s21_s20, 4   ;;  %s1033_s16 = smov %s737_s17 }
 0x160   : > { %s1034_s17 = smov %s889_s10  ;;  %s1035_s18 = smov %s745_s19 }
 0x161   : > { %s1036_s19 = smov %s1038_s5  ;;  %20 = sbr.rel (!%p18_p5) target bundleno = 7 (0x7), region = 89 }
 0x168   :  { %399 = vsyncpa [#allocation3], 1 }
 0x169   :  { %401 = vsyncpa [#allocation3 + $0x1], 1 }
 0x16a   :  { %402 = vsyncpa [#allocation6], 1 }
 0x16b   :  { %403 = vsyncpa [#allocation4], 1 }
 0x16c   :  { %405 = vsyncpa [#allocation4 + $0x1], 1 }

</bundles_post_ra>
